<compile_context>
chip_gen: v6e
topology: v6e:2x2x1
jax: 0.10.0
libtpu: 0.0.40
codegen_flags: <defaults>
</compile_context>

<pallas_src>
from functools import partial

import jax
import jax.numpy as jnp
from jax import lax
from jax.experimental import pallas as pl
from jax.experimental.pallas import tpu as pltpu


LN_EPS = 1e-5  # nn.LayerNorm default


def _patch_embed_kernel(x_ref, w_ref, p_ref, o_ref, *, inv_n):
    """Fused (patches @ W) -> LayerNorm(embed_dim).

    x_ref: (TM, K_pad)    row tile of the im2col matrix; column K holds 1.0
                          (conv bias is fused into weight row K)
    w_ref: (K_pad, E_pad) projection weight (+ bias row), resident over grid
    p_ref: (2, E_pad)     [ln_gamma; ln_beta] (zeros in padded columns)
    o_ref: (TM, E_pad)    output tile (padded columns come out exactly 0)
    """
    # MXU matmul (bf16 or f32 inputs), f32 accumulation.  Bias is fused:
    # patches[:, K] == 1 and w[K, :] == conv_b.
    y = jnp.dot(x_ref[...], w_ref[...], preferred_element_type=jnp.float32)

    params = p_ref[...].astype(jnp.float32)             # (2, E_pad)
    gamma = params[0:1, :]
    beta = params[1:2, :]

    # Single-pass LayerNorm statistics over the true embed_dim.  Padded columns
    # of y are exactly 0, so they do not perturb the sums; inv_n = 1/E_true.
    s = jnp.sum(y, axis=-1, keepdims=True)
    sq = jnp.sum(y * y, axis=-1, keepdims=True)
    mean = s * inv_n
    var = jnp.maximum(sq * inv_n - mean * mean, 0.0)     # guard tiny negatives
    rstd = lax.rsqrt(var + LN_EPS)

    out = (y - mean) * rstd * gamma + beta               # padded cols: gamma=beta=0
    o_ref[...] = out.astype(o_ref.dtype)


def prepare_patch_embed_params(conv_w, conv_b, ln_gamma, ln_beta,
                               *, matmul_dtype=jnp.bfloat16):
    """One-time parameter prep (hoisted out of the per-call path).

    conv_w (E, C, k, k) [PyTorch OIHW]  ->  w_mat (K_pad, E_pad) where
      * feature order is (kh, kw, C) matching the transpose-free NHWC im2col,
      * row K carries conv_b (bias fused into the matmul),
      * K_pad = round_up(K + 1, 128), E_pad = round_up(E, 128) (lane-dense).
    ln_gamma / ln_beta (E,) -> params (2, E_pad), zero-padded.
    """
    E, C, kh, kw = conv_w.shape
    K = C * kh * kw
    K_pad = pl.cdiv(K + 1, 128) * 128
    E_pad = pl.cdiv(E, 128) * 128

    w_mat = jnp.transpose(conv_w, (0, 2, 3, 1)).reshape(E, K).T      # (K, E)
    w_mat = jnp.concatenate([w_mat, conv_b.reshape(1, E)], axis=0)   # bias row
    w_mat = jnp.pad(w_mat, ((0, K_pad - (K + 1)), (0, E_pad - E)))
    w_mat = w_mat.astype(matmul_dtype)

    params = jnp.stack([ln_gamma, ln_beta], axis=0).astype(jnp.float32)
    params = jnp.pad(params, ((0, 0), (0, E_pad - E)))
    return w_mat, params


def _im2col_nhwc(x_nchw, k, stride, padding, dtype):
    """Transpose-free overlapping im2col.

    NCHW -> NHWC once (small transpose), pad spatially, take the k*k strided
    slabs as (B, Ho, Wo, C) and stack them on a new second-to-last axis: the
    result (B, Ho, Wo, k*k, C) is already in the weight's (kh, kw, C) feature
    order, so flattening needs no transpose of the big staging buffer.
    """
    B, C, H, W = x_nchw.shape
    h_out = (H + 2 * padding - k) // stride + 1
    w_out = (W + 2 * padding - k) // stride + 1

    x = jnp.transpose(x_nchw, (0, 2, 3, 1)).astype(dtype)   # (B, H, W, C)
    xp = jnp.pad(x, ((0, 0), (padding, padding), (padding, padding), (0, 0)))

    slabs = []
    for dh in range(k):
        for dw in range(k):
            sl = lax.slice(
                xp,
                (0, dh, dw, 0),
                (B, dh + (h_out - 1) * stride + 1,
                 dw + (w_out - 1) * stride + 1, C),
                (1, stride, stride, 1),
            )                                                # (B, Ho, Wo, C)
            slabs.append(sl)

    patches = jnp.stack(slabs, axis=3)                       # (B, Ho, Wo, k*k, C)
    return patches.reshape(B * h_out * w_out, k * k * C), (h_out, w_out)


@partial(jax.jit, static_argnames=("patch_size", "embed_dim", "tm", "matmul_dtype"))
def patch_embed_forward(x, w_mat, params, *, patch_size, embed_dim,
                        tm=512, matmul_dtype=jnp.bfloat16):
    """PatchEmbed forward (overlapping=True): Conv2d(k, s=k//2, p=k//2) -> LN.

    x:      (B, C, H, W)   NCHW, as in PyTorch
    w_mat:  (K_pad, E_pad) from prepare_patch_embed_params (same matmul_dtype)
    params: (2, E_pad)     [ln_gamma; ln_beta]
    returns (B, num_patches, embed_dim) in x.dtype
    """
    B, C, H, W = x.shape
    k = patch_size
    stride = k // 2
    padding = k // 2
    K = C * k * k
    K_pad, E_pad = w_mat.shape
    out_dtype = x.dtype

    patches, (h_out, w_out) = _im2col_nhwc(x, k, stride, padding, matmul_dtype)
    M = B * h_out * w_out

    # Row tile: as large as requested (per-step overhead ~0.35us), but shrink
    # so the grid keeps >= 2 steps — the "parallel" row axis is what lets
    # v7x's two TensorCores split the work.
    tm_eff = tm
    while tm_eff > 128 and pl.cdiv(M, tm_eff) < 2:
        tm_eff //= 2
    M_pad = pl.cdiv(M, tm_eff) * tm_eff

    # Append the fused-bias ones column at index K, then zero-pad rows/cols to
    # (M_pad, K_pad).  Padded rows/cols contribute nothing real (sliced off).
    patches = jnp.concatenate(
        [patches, jnp.ones((M, 1), dtype=matmul_dtype)], axis=1)
    patches = jnp.pad(patches, ((0, M_pad - M), (0, K_pad - (K + 1))))

    # Explicit VMEM budget: double-buffered patch/output tiles + resident
    # weight/params + f32 temporaries, 2x margin, capped at 64 MiB (v7x-safe).
    mm_b = jax.dtypes.canonicalize_dtype(matmul_dtype).itemsize
    out_b = jax.dtypes.canonicalize_dtype(out_dtype).itemsize
    vmem_est = (2 * tm_eff * K_pad * mm_b          # patch tiles (double-buffered)
                + 2 * K_pad * E_pad * mm_b         # resident weight buffers
                + 2 * 2 * E_pad * 4                # resident gamma/beta
                + 2 * tm_eff * E_pad * out_b       # output tiles
                + 4 * tm_eff * E_pad * 4)          # in-kernel f32 temporaries
    vmem_limit = int(min(64 * 1024 * 1024, max(2 * vmem_est, 4 * 1024 * 1024)))

    out_padded = pl.pallas_call(
        partial(_patch_embed_kernel, inv_n=1.0 / embed_dim),
        out_shape=jax.ShapeDtypeStruct((M_pad, E_pad), out_dtype),
        grid_spec=pltpu.PrefetchScalarGridSpec(
            num_scalar_prefetch=0,
            grid=(M_pad // tm_eff,),
            in_specs=[
                pl.BlockSpec((tm_eff, K_pad), lambda i: (i, 0)),
                pl.BlockSpec((K_pad, E_pad), lambda i: (0, 0)),   # resident
                pl.BlockSpec((2, E_pad), lambda i: (0, 0)),       # resident
            ],
            out_specs=pl.BlockSpec((tm_eff, E_pad), lambda i: (i, 0)),
        ),
        compiler_params=pltpu.CompilerParams(
            dimension_semantics=("parallel",),
            vmem_limit_bytes=vmem_limit),
    )(patches, w_mat, params)

    out = out_padded[:M, :embed_dim]
    return out.reshape(B, h_out * w_out, embed_dim)


def _reference(x, conv_w, conv_b, ln_gamma, ln_beta, patch_size):
    """Plain-JAX f32 reference matching the PyTorch module semantics."""
    k = patch_size
    stride = k // 2
    padding = k // 2
    y = lax.conv_general_dilated(
        x.astype(jnp.float32), conv_w.astype(jnp.float32),
        window_strides=(stride, stride),
        padding=((padding, padding), (padding, padding)),
        dimension_numbers=("NCHW", "OIHW", "NCHW"),
    ) + conv_b.reshape(1, -1, 1, 1)
    B, E, Ho, Wo = y.shape
    y = y.reshape(B, E, Ho * Wo).transpose(0, 2, 1)          # (B, N, E)
    mean = y.mean(-1, keepdims=True)
    var = ((y - mean) ** 2).mean(-1, keepdims=True)
    y = (y - mean) / jnp.sqrt(var + LN_EPS)
    return y * ln_gamma + ln_beta


if __name__ == "__main__":
    # Small shapes consistent with the module: img_size=16, patch_size=4,
    # in_chans=4, embed_dim=32, batch=2, overlapping=True
    B, C, H, W = 2, 4, 16, 16
    patch_size = 4
    embed_dim = 32

    key = jax.random.PRNGKey(0)
    kx, kw, kb, kg, kbe = jax.random.split(key, 5)

    x = jax.random.normal(kx, (B, C, H, W), dtype=jnp.float32)
    conv_w = 0.05 * jax.random.normal(
        kw, (embed_dim, C, patch_size, patch_size), dtype=jnp.float32)
    conv_b = 0.01 * jax.random.normal(kb, (embed_dim,), dtype=jnp.float32)
    ln_gamma = 1.0 + 0.1 * jax.random.normal(kg, (embed_dim,), dtype=jnp.float32)
    ln_beta = 0.1 * jax.random.normal(kbe, (embed_dim,), dtype=jnp.float32)

    # Expected: overlapping conv => h_out = w_out = (16 + 4 - 4)//2 + 1 = 9
    ref = _reference(x, conv_w, conv_b, ln_gamma, ln_beta, patch_size)

    # 1) f32 matmul path: tight-tolerance semantic check.
    w32, p32 = prepare_patch_embed_params(
        conv_w, conv_b, ln_gamma, ln_beta, matmul_dtype=jnp.float32)
    out32 = patch_embed_forward(x, w32, p32, patch_size=patch_size,
                                embed_dim=embed_dim, matmul_dtype=jnp.float32)
    out32 = jax.block_until_ready(out32)
    assert out32.shape == (B, 9 * 9, embed_dim), out32.shape
    assert jnp.allclose(out32, ref, atol=1e-4, rtol=1e-4), (
        float(jnp.max(jnp.abs(out32 - ref))))

    # 2) bf16 matmul path (default / production): halves HBM bytes for the
    #    staging read; LN stats stay f32, so only bf16 rounding remains.
    wbf, pbf = prepare_patch_embed_params(conv_w, conv_b, ln_gamma, ln_beta)
    outbf = patch_embed_forward(x, wbf, pbf, patch_size=patch_size,
                                embed_dim=embed_dim)
    outbf = jax.block_until_ready(outbf)
    assert outbf.shape == (B, 9 * 9, embed_dim), outbf.shape
    assert jnp.allclose(outbf.astype(jnp.float32), ref, atol=3e-2, rtol=3e-2), (
        float(jnp.max(jnp.abs(outbf.astype(jnp.float32) - ref))))

    print("KERNEL_OK")
</pallas_src>

<mosaic_0001>
module attributes {stable_mosaic.version = 11 : i64} {
  func.func @_patch_embed_kernel(%arg0: i32, %arg1: memref<128x128xf32, #tpu.memory_space<vmem>>, %arg2: memref<128x128xf32, #tpu.memory_space<vmem>>, %arg3: memref<2x128xf32, #tpu.memory_space<vmem>>, %arg4: memref<128x128xf32, #tpu.memory_space<vmem>>) attributes {dimension_semantics = [#tpu.dimension_semantics<parallel>], iteration_bounds = array<i64: 2>, scalar_prefetch = 0 : i64, scratch_operands = 0 : i64, tpu.core_type = #tpu.core_type<tc>, window_params = [{transform_indices = @transform_0, window_bounds = array<i64: 128, 128>}, {pipeline_mode = #tpu.pipeline_mode<synchronous>, transform_indices = @transform_1, window_bounds = array<i64: 128, 128>}, {pipeline_mode = #tpu.pipeline_mode<synchronous>, transform_indices = @transform_2, window_bounds = array<i64: 2, 128>}, {transform_indices = @transform_3, window_bounds = array<i64: 128, 128>}]} {
    %c0 = arith.constant 0 : index
    %c0_0 = arith.constant 0 : index
    %0 = vector.load %arg1[%c0, %c0_0] : memref<128x128xf32, #tpu.memory_space<vmem>>, vector<128x128xf32>
    %c0_1 = arith.constant 0 : index
    %c0_2 = arith.constant 0 : index
    %1 = vector.load %arg2[%c0_1, %c0_2] : memref<128x128xf32, #tpu.memory_space<vmem>>, vector<128x128xf32>
    %cst = arith.constant dense<0.000000e+00> : vector<128x128xf32>
    %2 = tpu.matmul %0, %1, %cst {dimension_numbers = #tpu.dot_dimension_numbers<[1], [0], [0], [1], [0, 0, 1, 1], [], []>} : vector<128x128xf32>, vector<128x128xf32>, vector<128x128xf32> -> vector<128x128xf32>
    %c0_3 = arith.constant 0 : index
    %c0_4 = arith.constant 0 : index
    %3 = vector.load %arg3[%c0_3, %c0_4] : memref<2x128xf32, #tpu.memory_space<vmem>>, vector<2x128xf32>
    %4 = vector.extract_strided_slice %3 {offsets = [0, 0], sizes = [1, 128], strides = [1, 1]} : vector<2x128xf32> to vector<1x128xf32>
    %5 = vector.extract_strided_slice %3 {offsets = [1, 0], sizes = [1, 128], strides = [1, 1]} : vector<2x128xf32> to vector<1x128xf32>
    %cst_5 = arith.constant dense<0.000000e+00> : vector<128xf32>
    %6 = vector.multi_reduction <add>, %2, %cst_5 [1] : vector<128x128xf32> to vector<128xf32>
    %7 = vector.shape_cast %6 : vector<128xf32> to vector<128x1xf32>
    %8 = arith.mulf %2, %2 : vector<128x128xf32>
    %cst_6 = arith.constant dense<0.000000e+00> : vector<128xf32>
    %9 = vector.multi_reduction <add>, %8, %cst_6 [1] : vector<128x128xf32> to vector<128xf32>
    %10 = vector.shape_cast %9 : vector<128xf32> to vector<128x1xf32>
    %cst_7 = arith.constant 3.125000e-02 : f32
    %11 = vector.broadcast %cst_7 : f32 to vector<128x1xf32>
    %12 = arith.mulf %7, %11 : vector<128x1xf32>
    %cst_8 = arith.constant 3.125000e-02 : f32
    %13 = vector.broadcast %cst_8 : f32 to vector<128x1xf32>
    %14 = arith.mulf %10, %13 : vector<128x1xf32>
    %15 = arith.mulf %12, %12 : vector<128x1xf32>
    %16 = arith.subf %14, %15 : vector<128x1xf32>
    %cst_9 = arith.constant 0.000000e+00 : f32
    %17 = vector.broadcast %cst_9 : f32 to vector<128x1xf32>
    %18 = arith.maximumf %16, %17 : vector<128x1xf32>
    %cst_10 = arith.constant 9.99999974E-6 : f32
    %19 = vector.broadcast %cst_10 : f32 to vector<128x1xf32>
    %20 = arith.addf %18, %19 : vector<128x1xf32>
    %21 = math.rsqrt %20 : vector<128x1xf32>
    %22 = vector.broadcast %12 : vector<128x1xf32> to vector<128x128xf32>
    %23 = arith.subf %2, %22 : vector<128x128xf32>
    %24 = vector.broadcast %21 : vector<128x1xf32> to vector<128x128xf32>
    %25 = arith.mulf %23, %24 : vector<128x128xf32>
    %26 = vector.broadcast %4 : vector<1x128xf32> to vector<128x128xf32>
    %27 = arith.mulf %25, %26 : vector<128x128xf32>
    %28 = vector.broadcast %5 : vector<1x128xf32> to vector<128x128xf32>
    %29 = arith.addf %27, %28 : vector<128x128xf32>
    %c0_11 = arith.constant 0 : index
    %c0_12 = arith.constant 0 : index
    %30 = vector.load %arg4[%c0_11, %c0_12] : memref<128x128xf32, #tpu.memory_space<vmem>>, vector<128x128xf32>
    tpu.vector_store %arg4[%c0_11, %c0_12], %29 {strides = array<i32>} : memref<128x128xf32, #tpu.memory_space<vmem>>, vector<128x128xf32>,
    return
  }
  func.func @transform_0(%arg0: i32) -> (i32, i32) {
    %c0_i32 = arith.constant 0 : i32
    %c0_i32_0 = arith.constant 0 : i32
    return %arg0, %c0_i32 : i32, i32
  }
  func.func @transform_1(%arg0: i32) -> (i32, i32) {
    %c0_i32 = arith.constant 0 : i32
    %c0_i32_0 = arith.constant 0 : i32
    %c0_i32_1 = arith.constant 0 : i32
    return %c0_i32, %c0_i32_0 : i32, i32
  }
  func.func @transform_2(%arg0: i32) -> (i32, i32) {
    %c0_i32 = arith.constant 0 : i32
    %c0_i32_0 = arith.constant 0 : i32
    %c0_i32_1 = arith.constant 0 : i32
    return %c0_i32, %c0_i32_0 : i32, i32
  }
  func.func @transform_3(%arg0: i32) -> (i32, i32) {
    %c0_i32 = arith.constant 0 : i32
    %c0_i32_0 = arith.constant 0 : i32
    return %arg0, %c0_i32 : i32, i32
  }
}

</mosaic_0001>

<bundles_post_ra>
// kernel: patch_embed_forward.1
= control target key start
LH: loop header
LB: loop body
LE: loop exit
PB: predicated region body
PF: predicated region fallthrough
CT: control target
= control target key end

     0   :  { %s887_s12 = smov 0   ;;  %s1207_s0 = inlined_call_operand.vmem [shape: f32[256,128], index: 0, kind: input, shape index: {}]   ;;  %s1208_s1 = inlined_call_operand.vmem [shape: f32[128,128], index: 1, kind: input, shape index: {}]   ;;  %s1209_s2 = inlined_call_operand.vmem [shape: f32[2,128], index: 2, kind: input, shape index: {}]   ;;  %s1210_s3 = inlined_call_operand.vmem [shape: f32[256,128], index: 3, kind: output, shape index: {}]  }
   0x1 LB: > { %s688_s13 = sadd.s32 4294967295, %s865_s12   ;;  %p692_p0 = scmp.ge.s32.totalorder %s865_s12, 1  ;;  %s865_s12 = sphi %s887_s12, %s13_s12  }
   0x2   : > { %p138_p1 = scmp.lt.s32.totalorder %s865_s12, 3 }
   0x4   : > { %p139_p2 = pnand %p692_p0, %p138_p1 }
   0x5   : > { %s693_s30 = sshll.u32 (!%p139_p2), %s688_s13, 4 }
   0x6   : > { %142 = sbr.rel (%p139_p2) target bundleno = 466 (0x1d2), region = 32  ;;  %p163_p3 = scmp.lt.s32.totalorder (!%p139_p2), %s693_s30, 31 }
   0xb   : > { %v205_v0 = vld [vmem:[%s1208_s1 + $0x78] sm:$0xff]  ;;  %v204_v1 = vld [vmem:[%s1208_s1 + $0x70] sm:$0xff]  ;;  %v203_v2 = vld [vmem:[%s1208_s1 + $0x68] sm:$0xff]  ;;  %s1212_s30 = smov (!%p163_p3, %s693_s30), 31 }
   0xc   : > { %731 = vmatprep.subr.mxu0 %v205_v0  ;;  %787 = vmatprep.subr.mxu1 %v205_v0  ;;  %v202_v3 = vld [vmem:[%s1208_s1 + $0x60] sm:$0xff]  ;;  %v201_v4 = vld [vmem:[%s1208_s1 + $0x58] sm:$0xff]  ;;  %v200_v5 = vld [vmem:[%s1208_s1 + $0x50] sm:$0xff]  ;;  %s694_s17 = sshll.u32 %s1212_s30, 3 }
   0xd   : > { %732 = vmatpush3.msra.mxu0 %v205_v0  ;;  %803 = vmatpush3.msra.mxu1 %v205_v0  ;;  %v199_v6 = vld [vmem:[%s1208_s1 + $0x48] sm:$0xff]  ;;  %v198_v7 = vld [vmem:[%s1208_s1 + $0x40] sm:$0xff]  ;;  %v197_v8 = vld [vmem:[%s1208_s1 + $0x38] sm:$0xff]  ;;  %s950_s22 = scalar_lea.vmem %s1207_s0, %s694_s17  ;;  %s1091_s29 = scalar_lea.vmem %s1210_s3, %s694_s17 }
   0xe   : > { %733 = vmatprep.subr.mxu0 %v204_v1  ;;  %788 = vmatprep.subr.mxu1 %v204_v1  ;;  %v196_v9 = vld [vmem:[%s1208_s1 + $0x30] sm:$0xff]  ;;  %v195_v10 = vld [vmem:[%s1208_s1 + $0x28] sm:$0xff]  ;;  %v194_v11 = vld [vmem:[%s1208_s1 + $0x20] sm:$0xff] }
   0xf   : > { %734 = vmatpush3.msra.mxu0 %v204_v1  ;;  %804 = vmatpush3.msra.mxu1 %v204_v1  ;;  %v193_v12 = vld [vmem:[%s1208_s1 + $0x18] sm:$0xff]  ;;  %v192_v13 = vld [vmem:[%s1208_s1 + $0x10] sm:$0xff]  ;;  %v191_v14 = vld [vmem:[%s1208_s1 + $0x8] sm:$0xff] }
  0x10   : > { %735 = vmatprep.subr.mxu0 %v203_v2  ;;  %789 = vmatprep.subr.mxu1 %v203_v2  ;;  %v190_v15 = vld [vmem:[%s1208_s1] sm:$0xff]  ;;  %v175_v18 = vld [vmem:[%s950_s22 + $0x8] sm:$0xff]  ;;  %v176_v20 = vld [vmem:[%s950_s22 + $0x10] sm:$0xff] }
  0x11   : > { %736 = vmatpush3.msra.mxu0 %v203_v2  ;;  %805 = vmatpush3.msra.mxu1 %v203_v2  ;;  %v174_v16 = vld [vmem:[%s950_s22] sm:$0xff]  ;;  %v183_v19 = vld [vmem:[%s950_s22 + $0x48] sm:$0xff]  ;;  %v184_v21 = vld [vmem:[%s950_s22 + $0x50] sm:$0xff] }
  0x12   : > { %737 = vmatprep.subr.mxu0 %v202_v3  ;;  %790 = vmatprep.subr.mxu1 %v202_v3  ;;  %v182_v17 = vld [vmem:[%s950_s22 + $0x40] sm:$0xff]  ;;  %v177_v22 = vld [vmem:[%s950_s22 + $0x18] sm:$0xff]  ;;  %v179_v26 = vld [vmem:[%s950_s22 + $0x28] sm:$0xff] }
  0x13   : > { %738 = vmatpush3.msra.mxu0 %v202_v3  ;;  %806 = vmatpush3.msra.mxu1 %v202_v3  ;;  %v185_v23 = vld [vmem:[%s950_s22 + $0x58] sm:$0xff]  ;;  %v178_v24 = vld [vmem:[%s950_s22 + $0x20] sm:$0xff]  ;;  %v187_v27 = vld [vmem:[%s950_s22 + $0x68] sm:$0xff] }
  0x14   : > { %739 = vmatprep.subr.mxu0 %v201_v4  ;;  %791 = vmatprep.subr.mxu1 %v201_v4  ;;  %v186_v25 = vld [vmem:[%s950_s22 + $0x60] sm:$0xff]  ;;  %v180_v28 = vld [vmem:[%s950_s22 + $0x30] sm:$0xff]  ;;  %v181_v30 = vld [vmem:[%s950_s22 + $0x38] sm:$0xff] }
  0x15   : > { %740 = vmatpush3.msra.mxu0 %v201_v4  ;;  %807 = vmatpush3.msra.mxu1 %v201_v4  ;;  %v188_v29 = vld [vmem:[%s950_s22 + $0x70] sm:$0xff]  ;;  %v189_v31 = vld [vmem:[%s950_s22 + $0x78] sm:$0xff] }
  0x16   : > { %741 = vmatprep.subr.mxu0 %v200_v5  ;;  %792 = vmatprep.subr.mxu1 %v200_v5 }
  0x17   : > { %742 = vmatpush3.msra.mxu0 %v200_v5  ;;  %808 = vmatpush3.msra.mxu1 %v200_v5 }
  0x18   : > { %743 = vmatprep.subr.mxu0 %v199_v6  ;;  %793 = vmatprep.subr.mxu1 %v199_v6 }
  0x19   : > { %744 = vmatpush3.msra.mxu0 %v199_v6  ;;  %809 = vmatpush3.msra.mxu1 %v199_v6 }
  0x1a   : > { %745 = vmatprep.subr.mxu0 %v198_v7  ;;  %794 = vmatprep.subr.mxu1 %v198_v7 }
  0x1b   : > { %746 = vmatpush3.msra.mxu0 %v198_v7  ;;  %810 = vmatpush3.msra.mxu1 %v198_v7 }
  0x1c   : > { %747 = vmatprep.subr.mxu0 %v197_v8  ;;  %795 = vmatprep.subr.mxu1 %v197_v8 }
  0x1d   : > { %748 = vmatpush3.msra.mxu0 %v197_v8  ;;  %811 = vmatpush3.msra.mxu1 %v197_v8 }
  0x1e   : > { %749 = vmatprep.subr.mxu0 %v196_v9  ;;  %796 = vmatprep.subr.mxu1 %v196_v9 }
  0x1f   : > { %750 = vmatpush3.msra.mxu0 %v196_v9  ;;  %812 = vmatpush3.msra.mxu1 %v196_v9 }
  0x20   : > { %751 = vmatprep.subr.mxu0 %v195_v10  ;;  %797 = vmatprep.subr.mxu1 %v195_v10 }
  0x21   : > { %752 = vmatpush3.msra.mxu0 %v195_v10  ;;  %813 = vmatpush3.msra.mxu1 %v195_v10 }
  0x22   : > { %753 = vmatprep.subr.mxu0 %v194_v11  ;;  %798 = vmatprep.subr.mxu1 %v194_v11 }
  0x23   : > { %754 = vmatpush3.msra.mxu0 %v194_v11  ;;  %814 = vmatpush3.msra.mxu1 %v194_v11 }
  0x24   : > { %755 = vmatprep.subr.mxu0 %v193_v12  ;;  %799 = vmatprep.subr.mxu1 %v193_v12 }
  0x25   : > { %756 = vmatpush3.msra.mxu0 %v193_v12  ;;  %815 = vmatpush3.msra.mxu1 %v193_v12 }
  0x26   : > { %757 = vmatprep.subr.mxu0 %v192_v13  ;;  %800 = vmatprep.subr.mxu1 %v192_v13 }
  0x27   : > { %758 = vmatpush3.msra.mxu0 %v192_v13  ;;  %816 = vmatpush3.msra.mxu1 %v192_v13 }
  0x28   : > { %759 = vmatprep.subr.mxu0 %v191_v14  ;;  %801 = vmatprep.subr.mxu1 %v191_v14 }
  0x29   : > { %760 = vmatpush3.msra.mxu0 %v191_v14  ;;  %817 = vmatpush3.msra.mxu1 %v191_v14 }
  0x2a   : > { %761 = vmatprep.subr.mxu0 %v190_v15  ;;  %802 = vmatprep.subr.mxu1 %v190_v15 }
  0x2b   : > { %762 = vmatpush3.msra.mxu0 %v190_v15  ;;  %818 = vmatpush3.msra.mxu1 %v190_v15 }
  0x2c   : > { %763 = vmatprep.mubr.f32.mxu0 %v174_v16  ;;  %775 = vmatprep.mubr.f32.mxu1 %v182_v17  ;;  %v576_v17 = vlaneseq }
  0x2d   : > { %764 = vmatmul.mubr.f32.vlgmr.msra.gmra.mxu0 %v175_v18  ;;  %776 = vmatmul.mubr.f32.vlgmr.msra.gmra.mxu1 %v183_v19 }
  0x2e   : > { %766 = vmatprep.mubr.f32.mxu0 %v176_v20  ;;  %778 = vmatprep.mubr.f32.mxu1 %v184_v21 }
  0x31   : > { %767 = vmatmul.mubr.f32.gmra.mxu0 %v177_v22  ;;  %779 = vmatmul.mubr.f32.gmra.mxu1 %v185_v23 }
  0x32   : > { %769 = vmatprep.mubr.f32.mxu0 %v178_v24  ;;  %781 = vmatprep.mubr.f32.mxu1 %v186_v25 }
  0x35   : > { %770 = vmatmul.mubr.f32.gmra.mxu0 %v179_v26  ;;  %782 = vmatmul.mubr.f32.gmra.mxu1 %v187_v27  ;;  %v577_v26 = vshrl.u32 %v576_v17, 7 }
  0x36   : > { %772 = vmatprep.mubr.f32.mxu0 %v180_v28  ;;  %784 = vmatprep.mubr.f32.mxu1 %v188_v29 }
  0x39   : > { %773 = vmatmul.mubr.f32.gmra.mxu0 %v181_v30  ;;  %785 = vmatmul.mubr.f32.gmra.mxu1 %v189_v31 }
  0xed   : > { %v971_v32 = vpop.f32.mrf.mxu0  ;;  %v973_v33 = vpop.f32.mrf.mxu1 }
  0xee   : > { %370 = vadd.xlane.f32.xlu1 %v973_v33  ;;  %354 = vadd.xlane.f32.xlu0 %v971_v32  ;;  %v385_v34 = vmul.f32 %v971_v32, %v971_v32  ;;  %v393_v36 = vmul.f32 %v973_v33, %v973_v33 }
  0xef   : > { %v979_v35 = vpop.f32.mrf.mxu0  ;;  %v984_v37 = vpop.f32.mrf.mxu1 }
  0xf0   : > { %v384_v38 = vmul.f32 %v979_v35, %v979_v35  ;;  %v392_v40 = vmul.f32 %v984_v37, %v984_v37 }
  0xf1   : > { %v989_v39 = vpop.f32.mrf.mxu0  ;;  %v994_v41 = vpop.f32.mrf.mxu1 }
  0xf2   : > { %402 = vadd.xlane.f32.xlu1 %v385_v34  ;;  %352 = vadd.xlane.f32.xlu0 %v979_v35  ;;  %v387_v44 = vmul.f32 %v989_v39, %v989_v39  ;;  %v395_v46 = vmul.f32 %v994_v41, %v994_v41 }
  0xf3   : > { %v997_v42 = vpop.f32.mrf.mxu0  ;;  %v999_v43 = vpop.f32.mrf.mxu1 }
  0xf4   : > { %v386_v45 = vmul.f32 %v997_v42, %v997_v42  ;;  %v394_v47 = vmul.f32 %v999_v43, %v999_v43 }
  0xf5   : > { %v1011_v48 = vpop.f32.mrf.mxu0  ;;  %v1015_v50 = vpop.f32.mrf.mxu1 }
  0xf6   : > { %418 = vadd.xlane.f32.xlu1 %v393_v36  ;;  %368 = vadd.xlane.f32.xlu0 %v984_v37  ;;  %v389_v52 = vmul.f32 %v1011_v48, %v1011_v48  ;;  %v397_v54 = vmul.f32 %v1015_v50, %v1015_v50 }
  0xf7   : > { %v1013_v49 = vpop.f32.mrf.mxu0  ;;  %v1019_v51 = vpop.f32.mrf.mxu1 }
  0xf8   : > { %v388_v53 = vmul.f32 %v1013_v49, %v1013_v49  ;;  %v396_v55 = vmul.f32 %v1019_v51, %v1019_v51 }
  0xf9   : > { %v1031_v56 = vpop.f32.mrf.mxu0  ;;  %v1035_v58 = vpop.f32.mrf.mxu1 }
  0xfa   : > { %400 = vadd.xlane.f32.xlu0 %v384_v38  ;;  %358 = vadd.xlane.f32.xlu1 %v989_v39  ;;  %v391_v60 = vmul.f32 %v1031_v56, %v1031_v56  ;;  %v399_v62 = vmul.f32 %v1035_v58, %v1035_v58  ;;  %v578_v38 = vsub.s32 0, %v577_v26 }
  0xfb   : > { %v1033_v57 = vpop.f32.mrf.mxu0  ;;  %v1039_v59 = vpop.f32.mrf.mxu1 }
  0xfc   : > { %v390_v61 = vmul.f32 %v1033_v57, %v1033_v57  ;;  %v398_v63 = vmul.f32 %v1039_v59, %v1039_v59 }
  0xfe   : > { %416 = vadd.xlane.f32.xlu0 %v392_v40  ;;  %374 = vadd.xlane.f32.xlu1 %v994_v41 }
 0x102   : > { %372 = vadd.xlane.f32.xlu0 %v999_v43  ;;  %356 = vadd.xlane.f32.xlu1 %v997_v42 }
 0x106   : > { %406 = vadd.xlane.f32.xlu1 %v387_v44  ;;  %404 = vadd.xlane.f32.xlu0 %v386_v45 }
 0x10a   : > { %422 = vadd.xlane.f32.xlu1 %v395_v46  ;;  %420 = vadd.xlane.f32.xlu0 %v394_v47  ;;  %v351_v46 = vld [vmem:[%s1209_s2] sm:$0x3] }
 0x10e   : > { %362 = vadd.xlane.f32.xlu1 %v1011_v48  ;;  %360 = vadd.xlane.f32.xlu0 %v1013_v49 }
 0x112   : > { %378 = vadd.xlane.f32.xlu1 %v1015_v50  ;;  %376 = vadd.xlane.f32.xlu0 %v1019_v51 }
 0x116   : > { %410 = vadd.xlane.f32.xlu1 %v389_v52  ;;  %408 = vadd.xlane.f32.xlu0 %v388_v53  ;;  %v598_v53 = vsub.s32 1, %v577_v26 }
 0x11a   : > { %426 = vadd.xlane.f32.xlu1 %v397_v54  ;;  %424 = vadd.xlane.f32.xlu0 %v396_v55 }
 0x11e   : > { %366 = vadd.xlane.f32.xlu1 %v1031_v56  ;;  %364 = vadd.xlane.f32.xlu0 %v1033_v57 }
 0x122   : > { %382 = vadd.xlane.f32.xlu1 %v1035_v58  ;;  %380 = vadd.xlane.f32.xlu0 %v1039_v59 }
 0x126   : > { %414 = vadd.xlane.f32.xlu1 %v391_v60  ;;  %412 = vadd.xlane.f32.xlu0 %v390_v61  ;;  %v1071_v60 = vrot.slane %v351_v46, %v578_v38 }
 0x12a   : > { %430 = vadd.xlane.f32.xlu1 %v399_v62  ;;  %428 = vadd.xlane.f32.xlu0 %v398_v63 }
 0x177   : > { %v371_v0 = vpop.xlane.xlu1 %370  ;;  %v355_v1 = vpop.xlane.xlu0 %354 }
 0x178   : > { %v433_v2 = vmul.f32 0.03125, %v355_v1  ;;  %v1051_v5 = vmul.f32 0.03125, %v371_v0 }
 0x17a   : > { %v465_v6 = vmul.f32 %v433_v2, %v433_v2  ;;  %v473_v12 = vmul.f32 %v1051_v5, %v1051_v5  ;;  %v545_v55 = vsub.f32 %v971_v32, %v433_v2  ;;  %v1081_v32 = vrot.slane %v351_v46, %v598_v53 }
 0x17b   : > { %v403_v3 = vpop.xlane.xlu1 %402  ;;  %v353_v4 = vpop.xlane.xlu0 %352 }
 0x17c   : > { %v449_v7 = vmul.f32 0.03125, %v403_v3  ;;  %v1053_v9 = vmul.f32 0.03125, %v353_v4 }
 0x17e   : > { %v481_v8 = vsub.f32 %v449_v7, %v465_v6  ;;  %v464_v18 = vmul.f32 %v1053_v9, %v1053_v9 }
 0x17f   : > { %v419_v10 = vpop.xlane.xlu1 %418  ;;  %v369_v11 = vpop.xlane.xlu0 %368 }
 0x180   : > { %v497_v13 = vmax.f32 %v481_v8, 0.0  ;;  %v457_v14 = vmul.f32 0.03125, %v419_v10  ;;  %v1059_v22 = vmul.f32 0.03125, %v369_v11  ;;  %v553_v11 = vsub.f32 %v973_v33, %v1051_v5 }
 0x182   : > { %v513_v15 = vadd.f32 1e-05, %v497_v13  ;;  %v489_v16 = vsub.f32 %v457_v14, %v473_v12  ;;  %v472_v29 = vmul.f32 %v1059_v22, %v1059_v22 }
 0x183   : > { %v401_v19 = vpop.xlane.xlu0 %400  ;;  %v359_v20 = vpop.xlane.xlu1 %358 }
 0x184   : > { %827 = vrsqrt.f32 %v513_v15  ;;  %v505_v21 = vmax.f32 %v489_v16, 0.0  ;;  %v448_v23 = vmul.f32 0.03125, %v401_v19  ;;  %v1063_v40 = vmul.f32 0.03125, %v359_v20 }
 0x186   : > { %v521_v24 = vadd.f32 1e-05, %v505_v21  ;;  %v480_v25 = vsub.f32 %v448_v23, %v464_v18  ;;  %v467_v61 = vmul.f32 %v1063_v40, %v1063_v40 }
 0x187   : > { %v417_v27 = vpop.xlane.xlu0 %416  ;;  %v375_v28 = vpop.xlane.xlu1 %374 }
 0x188   : > { %829 = vrsqrt.f32 %v521_v24  ;;  %v496_v30 = vmax.f32 %v480_v25, 0.0  ;;  %v456_v31 = vmul.f32 0.03125, %v417_v27  ;;  %v1077_v6 = vmul.f32 0.03125, %v375_v28 }
 0x18a   : > { %v512_v34 = vadd.f32 1e-05, %v496_v30  ;;  %v488_v36 = vsub.f32 %v456_v31, %v472_v29  ;;  %v475_v19 = vmul.f32 %v1077_v6, %v1077_v6  ;;  %v544_v29 = vsub.f32 %v979_v35, %v1053_v9 }
 0x18b   : > { %v373_v44 = vpop.xlane.xlu0 %372  ;;  %v357_v45 = vpop.xlane.xlu1 %356  ;;  %v552_v35 = vsub.f32 %v984_v37, %v1059_v22 }
 0x18c   : > { %831 = vrsqrt.f32 %v512_v34  ;;  %v504_v47 = vmax.f32 %v488_v36, 0.0  ;;  %v1068_v52 = vmul.f32 0.03125, %v357_v45  ;;  %v1079_v7 = vmul.f32 0.03125, %v373_v44 }
 0x18e   : > { %v520_v54 = vadd.f32 1e-05, %v504_v47  ;;  %v466_v0 = vmul.f32 %v1068_v52, %v1068_v52  ;;  %v474_v33 = vmul.f32 %v1079_v7, %v1079_v7 }
 0x18f   : > { %v407_v62 = vpop.xlane.xlu1 %406  ;;  %v405_v63 = vpop.xlane.xlu0 %404 }
 0x190   : > { %833 = vrsqrt.f32 %v520_v54  ;;  %v451_v1 = vmul.f32 0.03125, %v407_v62  ;;  %v450_v3 = vmul.f32 0.03125, %v405_v63 }
 0x191   : > { %v828_v4 = vpop.eup %827 }
 0x192   : > { %v561_v2 = vmul.f32 %v828_v4, %v545_v55  ;;  %v483_v8 = vsub.f32 %v451_v1, %v467_v61  ;;  %v482_v10 = vsub.f32 %v450_v3, %v466_v0 }
 0x193   : > { %v423_v12 = vpop.xlane.xlu1 %422  ;;  %v421_v13 = vpop.xlane.xlu0 %420 }
 0x194   : > { %v581_v14 = vmul.f32 %v1071_v60, %v561_v2  ;;  %v499_v15 = vmax.f32 %v483_v8, 0.0  ;;  %v498_v16 = vmax.f32 %v482_v10, 0.0  ;;  %v459_v17 = vmul.f32 0.03125, %v423_v12 }
 0x195   : > { %v830_v18 = vpop.eup %829  ;;  %v458_v5 = vmul.f32 0.03125, %v421_v13 }
 0x196   : > { %v601_v20 = vadd.f32 %v1081_v32, %v581_v14  ;;  %v569_v21 = vmul.f32 %v830_v18, %v553_v11  ;;  %v515_v23 = vadd.f32 1e-05, %v499_v15  ;;  %v514_v24 = vadd.f32 1e-05, %v498_v16 }
 0x197   : > { %v491_v25 = vsub.f32 %v459_v17, %v475_v19  ;;  %v490_v26 = vsub.f32 %v458_v5, %v474_v33  ;;  %v363_v27 = vpop.xlane.xlu1 %362  ;;  %v361_v28 = vpop.xlane.xlu0 %360  ;;  %v547_v14 = vsub.f32 %v989_v39, %v1063_v40 }
 0x198   : > { %617 = vst [vmem:[%s1091_s29 + $0x8] sm:$0xff] %v601_v20  ;;  %v589_v30 = vmul.f32 %v1071_v60, %v569_v21  ;;  %835 = vrsqrt.f32 %v515_v23  ;;  %v1103_v47 = vmul.f32 0.03125, %v363_v27  ;;  %v1109_v55 = vmul.f32 0.03125, %v361_v28 }
 0x199   : > { %v832_v31 = vpop.eup %831  ;;  %837 = vrsqrt.f32 %v514_v24  ;;  %v507_v34 = vmax.f32 %v491_v25, 0.0  ;;  %v506_v36 = vmax.f32 %v490_v26, 0.0  ;;  %v546_v21 = vsub.f32 %v997_v42, %v1068_v52 }
 0x19a   : > { %v609_v38 = vadd.f32 %v1081_v32, %v589_v30  ;;  %v560_v44 = vmul.f32 %v832_v31, %v544_v29  ;;  %v469_v0 = vmul.f32 %v1103_v47, %v1103_v47  ;;  %v468_v22 = vmul.f32 %v1109_v55, %v1109_v55 }
 0x19b   : > { %v523_v45 = vadd.f32 1e-05, %v507_v34  ;;  %v522_v46 = vadd.f32 1e-05, %v506_v36  ;;  %v379_v53 = vpop.xlane.xlu1 %378  ;;  %v377_v54 = vpop.xlane.xlu0 %376  ;;  %v555_v42 = vsub.f32 %v994_v41, %v1077_v6 }
 0x19c   : > { %625 = vst [vmem:[%s1091_s29 + $0x48] sm:$0xff] %v609_v38  ;;  %v580_v9 = vmul.f32 %v1071_v60, %v560_v44  ;;  %v1114_v1 = vmul.f32 0.03125, %v379_v53  ;;  %v1120_v10 = vmul.f32 0.03125, %v377_v54  ;;  %v554_v44 = vsub.f32 %v999_v43, %v1079_v7 }
 0x19d   : > { %v834_v61 = vpop.eup %833  ;;  %839 = vrsqrt.f32 %v523_v45 }
 0x19e   : > { %v600_v62 = vadd.f32 %v1081_v32, %v580_v9  ;;  %v568_v63 = vmul.f32 %v834_v61, %v552_v35  ;;  %841 = vrsqrt.f32 %v522_v46  ;;  %v477_v15 = vmul.f32 %v1114_v1, %v1114_v1 }
 0x19f   : > { %v411_v3 = vpop.xlane.xlu1 %410  ;;  %v409_v4 = vpop.xlane.xlu0 %408  ;;  %v476_v23 = vmul.f32 %v1120_v10, %v1120_v10 }
 0x1a0   : > { %616 = vst [vmem:[%s1091_s29] sm:$0xff] %v600_v62  ;;  %v588_v37 = vmul.f32 %v1071_v60, %v568_v63  ;;  %v453_v2 = vmul.f32 0.03125, %v411_v3  ;;  %v452_v8 = vmul.f32 0.03125, %v409_v4 }
 0x1a2   : > { %v608_v11 = vadd.f32 %v1081_v32, %v588_v37  ;;  %v485_v12 = vsub.f32 %v453_v2, %v469_v0  ;;  %v484_v13 = vsub.f32 %v452_v8, %v468_v22 }
 0x1a3   : > { %v427_v16 = vpop.xlane.xlu1 %426  ;;  %v425_v17 = vpop.xlane.xlu0 %424 }
 0x1a4   : > { %624 = vst [vmem:[%s1091_s29 + $0x40] sm:$0xff] %v608_v11  ;;  %v501_v18 = vmax.f32 %v485_v12, 0.0  ;;  %v500_v19 = vmax.f32 %v484_v13, 0.0  ;;  %v461_v33 = vmul.f32 0.03125, %v427_v16  ;;  %v460_v5 = vmul.f32 0.03125, %v425_v17 }
 0x1a5   : > { %v836_v20 = vpop.eup %835  ;;  %v549_v16 = vsub.f32 %v1011_v48, %v1103_v47 }
 0x1a6   : > { %v838_v24 = vpop.eup %837  ;;  %v563_v25 = vmul.f32 %v836_v20, %v547_v14  ;;  %v517_v39 = vadd.f32 1e-05, %v501_v18  ;;  %v516_v40 = vadd.f32 1e-05, %v500_v19  ;;  %v493_v26 = vsub.f32 %v461_v33, %v477_v15 }
 0x1a7   : > { %v562_v27 = vmul.f32 %v838_v24, %v546_v21  ;;  %v492_v28 = vsub.f32 %v460_v5, %v476_v23  ;;  %v367_v29 = vpop.xlane.xlu1 %366  ;;  %v365_v30 = vpop.xlane.xlu0 %364  ;;  %v548_v24 = vsub.f32 %v1013_v49, %v1109_v55  ;;  %v556_v55 = vsub.f32 %v1019_v51, %v1120_v10 }
 0x1a8   : > { %v583_v31 = vmul.f32 %v1071_v60, %v563_v25  ;;  %843 = vrsqrt.f32 %v517_v39  ;;  %v509_v34 = vmax.f32 %v493_v26, 0.0  ;;  %v1140_v61 = vmul.f32 0.03125, %v367_v29 }
 0x1a9   : > { %v582_v52 = vmul.f32 %v1071_v60, %v562_v27  ;;  %845 = vrsqrt.f32 %v516_v40  ;;  %v508_v36 = vmax.f32 %v492_v28, 0.0  ;;  %v1143_v63 = vmul.f32 0.03125, %v365_v30 }
 0x1aa   : > { %v840_v38 = vpop.eup %839  ;;  %v603_v45 = vadd.f32 %v1081_v32, %v583_v31  ;;  %v525_v46 = vadd.f32 1e-05, %v509_v34  ;;  %v471_v3 = vmul.f32 %v1140_v61, %v1140_v61  ;;  %v557_v29 = vsub.f32 %v1015_v50, %v1114_v1 }
 0x1ab   : > { %v842_v53 = vpop.eup %841  ;;  %v602_v54 = vadd.f32 %v1081_v32, %v582_v52  ;;  %v571_v35 = vmul.f32 %v840_v38, %v555_v42  ;;  %v524_v9 = vadd.f32 1e-05, %v508_v36  ;;  %v383_v41 = vpop.xlane.xlu1 %382  ;;  %v470_v8 = vmul.f32 %v1143_v63, %v1143_v63 }
 0x1ac   : > { %v381_v6 = vpop.xlane.xlu0 %380  ;;  %619 = vst [vmem:[%s1091_s29 + $0x18] sm:$0xff] %v603_v45  ;;  %v570_v62 = vmul.f32 %v842_v53, %v554_v44  ;;  %847 = vrsqrt.f32 %v525_v46  ;;  %v1151_v4 = vmul.f32 0.03125, %v383_v41 }
 0x1ad   : > { %618 = vst [vmem:[%s1091_s29 + $0x10] sm:$0xff] %v602_v54  ;;  %v591_v43 = vmul.f32 %v1071_v60, %v571_v35  ;;  %849 = vrsqrt.f32 %v524_v9  ;;  %v1157_v13 = vmul.f32 0.03125, %v381_v6  ;;  %v551_v54 = vsub.f32 %v1031_v56, %v1140_v61 }
 0x1ae   : > { %v590_v7 = vmul.f32 %v1071_v60, %v570_v62  ;;  %v479_v17 = vmul.f32 %v1151_v4, %v1151_v4  ;;  %v550_v9 = vsub.f32 %v1033_v57, %v1143_v63 }
 0x1af   : > { %v611_v0 = vadd.f32 %v1081_v32, %v591_v43  ;;  %v415_v37 = vpop.xlane.xlu1 %414  ;;  %v478_v25 = vmul.f32 %v1157_v13, %v1157_v13  ;;  %v559_v43 = vsub.f32 %v1035_v58, %v1151_v4  ;;  %v558_v56 = vsub.f32 %v1039_v59, %v1157_v13 }
 0x1b0   : > { %v413_v22 = vpop.xlane.xlu0 %412  ;;  %v610_v2 = vadd.f32 %v1081_v32, %v590_v7  ;;  %v455_v11 = vmul.f32 0.03125, %v415_v37 }
 0x1b1   : > { %v454_v12 = vmul.f32 0.03125, %v413_v22  ;;  %627 = vst [vmem:[%s1091_s29 + $0x58] sm:$0xff] %v611_v0 }
 0x1b2   : > { %626 = vst [vmem:[%s1091_s29 + $0x50] sm:$0xff] %v610_v2  ;;  %v487_v14 = vsub.f32 %v455_v11, %v471_v3 }
 0x1b3   : > { %v486_v15 = vsub.f32 %v454_v12, %v470_v8  ;;  %v431_v18 = vpop.xlane.xlu1 %430 }
 0x1b4   : > { %v429_v19 = vpop.xlane.xlu0 %428  ;;  %v503_v33 = vmax.f32 %v487_v14, 0.0  ;;  %v463_v20 = vmul.f32 0.03125, %v431_v18 }
 0x1b5   : > { %v502_v5 = vmax.f32 %v486_v15, 0.0  ;;  %v462_v21 = vmul.f32 0.03125, %v429_v19  ;;  %v844_v23 = vpop.eup %843 }
 0x1b6   : > { %v846_v39 = vpop.eup %845  ;;  %v565_v40 = vmul.f32 %v844_v23, %v549_v16  ;;  %v519_v26 = vadd.f32 1e-05, %v503_v33  ;;  %v495_v47 = vsub.f32 %v463_v20, %v479_v17 }
 0x1b7   : > { %v518_v48 = vadd.f32 1e-05, %v502_v5  ;;  %v564_v27 = vmul.f32 %v846_v39, %v548_v24  ;;  %v494_v28 = vsub.f32 %v462_v21, %v478_v25 }
 0x1b8   : > { %v585_v30 = vmul.f32 %v1071_v60, %v565_v40  ;;  %851 = vrsqrt.f32 %v519_v26  ;;  %v511_v31 = vmax.f32 %v495_v47, 0.0 }
 0x1b9   : > { %v848_v49 = vpop.eup %847  ;;  %v584_v34 = vmul.f32 %v1071_v60, %v564_v27  ;;  %853 = vrsqrt.f32 %v518_v48  ;;  %v510_v42 = vmax.f32 %v494_v28, 0.0 }
 0x1ba   : > { %v850_v52 = vpop.eup %849  ;;  %v605_v36 = vadd.f32 %v1081_v32, %v585_v30  ;;  %v573_v50 = vmul.f32 %v848_v49, %v557_v29  ;;  %v527_v1 = vadd.f32 1e-05, %v511_v31 }
 0x1bb   : > { %v604_v38 = vadd.f32 %v1081_v32, %v584_v34  ;;  %v572_v44 = vmul.f32 %v850_v52, %v556_v55  ;;  %v526_v45 = vadd.f32 1e-05, %v510_v42 }
 0x1bc   : > { %621 = vst [vmem:[%s1091_s29 + $0x28] sm:$0xff] %v605_v36  ;;  %v593_v46 = vmul.f32 %v1071_v60, %v573_v50  ;;  %855 = vrsqrt.f32 %v527_v1 }
 0x1bd   : > { %620 = vst [vmem:[%s1091_s29 + $0x20] sm:$0xff] %v604_v38  ;;  %v592_v51 = vmul.f32 %v1071_v60, %v572_v44  ;;  %857 = vrsqrt.f32 %v526_v45 }
 0x1be   : > { %v613_v10 = vadd.f32 %v1081_v32, %v593_v46 }
 0x1bf   : > { %v612_v53 = vadd.f32 %v1081_v32, %v592_v51 }
 0x1c0   : > { %629 = vst [vmem:[%s1091_s29 + $0x68] sm:$0xff] %v613_v10 }
 0x1c1   : > { %628 = vst [vmem:[%s1091_s29 + $0x60] sm:$0xff] %v612_v53 }
 0x1c5   : > { %v852_v35 = vpop.eup %851 }
 0x1c6   : > { %v854_v41 = vpop.eup %853  ;;  %v567_v6 = vmul.f32 %v852_v35, %v551_v54 }
 0x1c7   : > { %v566_v62 = vmul.f32 %v854_v41, %v550_v9 }
 0x1c8   : > { %v587_v7 = vmul.f32 %v1071_v60, %v567_v6 }
 0x1c9   : > { %v856_v0 = vpop.eup %855  ;;  %v586_v61 = vmul.f32 %v1071_v60, %v566_v62 }
 0x1ca   : > { %v858_v3 = vpop.eup %857  ;;  %v607_v57 = vadd.f32 %v1081_v32, %v587_v7  ;;  %v575_v63 = vmul.f32 %v856_v0, %v559_v43 }
 0x1cb   : > { %v606_v37 = vadd.f32 %v1081_v32, %v586_v61  ;;  %v574_v22 = vmul.f32 %v858_v3, %v558_v56 }
 0x1cc   : > { %623 = vst [vmem:[%s1091_s29 + $0x38] sm:$0xff] %v607_v57  ;;  %v595_v58 = vmul.f32 %v1071_v60, %v575_v63 }
 0x1cd   : > { %622 = vst [vmem:[%s1091_s29 + $0x30] sm:$0xff] %v606_v37  ;;  %v594_v4 = vmul.f32 %v1071_v60, %v574_v22 }
 0x1ce   : > { %v615_v2 = vadd.f32 %v1081_v32, %v595_v58 }
 0x1cf   : > { %v614_v8 = vadd.f32 %v1081_v32, %v594_v4 }
 0x1d0   : > { %631 = vst [vmem:[%s1091_s29 + $0x78] sm:$0xff] %v615_v2 }
 0x1d1   : > { %630 = vst [vmem:[%s1091_s29 + $0x70] sm:$0xff] %v614_v8 }
 0x1d2 PF: > { %s13_s12 = sadd.s32 1, %s865_s12  }
 0x1d3   : > { %p10_p4 = scmp.ge.s32.totalorder %s13_s12, 4  }
 0x1d5   :  { %12 = sbr.rel (!%p10_p4) target bundleno = 1 (0x1), region = 62 }

</bundles_post_ra>
